<compile_context>
chip_gen: v7x
topology: tpu7x:2x2x1
jax: 0.10.0
libtpu: 0.0.40
codegen_flags: <defaults>
</compile_context>

<pallas_src>
import math

import jax
import jax.numpy as jnp
from jax.experimental import pallas as pl
from jax.experimental.pallas import tpu as pltpu


def _drop_path_kernel(x_ref, m_ref, o_ref):
    # x_ref: (tb, tf) tile of the flattened (B, F) input
    # m_ref: (tb, 1) per-sample mask tile (already scaled, in x dtype)
    # o_ref: (tb, tf) output tile
    o_ref[...] = x_ref[...] * m_ref[...]


def _pick_tiles(B, F, itemsize, block_budget):
    """Choose (tb, tf) obeying the (8, 128) / full-extent rule, preferring
    contiguous full-row feature tiles."""
    row_bytes = max(F * itemsize, 1)
    if row_bytes <= block_budget:
        # Full rows: one contiguous HBM range per block.
        tf = F
        tb_max = max(block_budget // row_bytes, 1)
        if B <= tb_max:
            tb = B                                  # full extent -> exempt
        else:
            tb = max((tb_max // 8) * 8, 8)          # multiple of 8
            tb = min(tb, B)
    else:
        # A single row is bigger than the budget: split the feature axis.
        tb = B if B <= 8 else 8
        tf_max = max(block_budget // (tb * itemsize), 128)
        tf = max((tf_max // 128) * 128, 128)        # multiple of 128
        tf = min(tf, F)
    return tb, tf


def drop_path_pallas(x, drop_prob=0.0, training=False, scale_by_keep=True, *,
                     seed=0, max_block_bytes=None, donate_x=False):
    """DropPath forward. Identity unless (training and drop_prob > 0)."""
    if drop_prob == 0.0 or not training:
        return x                                    # matches torch forward

    keep_prob = 1.0 - float(drop_prob)

    B = x.shape[0]
    F = math.prod(x.shape[1:]) if x.ndim > 1 else 1
    x2d = x.reshape(B, F)
    itemsize = x2d.dtype.itemsize

    # Per-sample mask, built outside the kernel (tiny: B scalars) in x dtype,
    # pre-scaled by 1/keep_prob when requested (same as timm).
    key = jax.random.PRNGKey(seed)
    keep = jax.random.bernoulli(key, p=keep_prob, shape=(B,))
    scale = (1.0 / keep_prob) if (scale_by_keep and keep_prob > 0.0) else 1.0
    mask = (keep.astype(x2d.dtype) * jnp.asarray(scale, x2d.dtype)).reshape(B, 1)

    # Generation-aware block budget / VMEM limit.
    try:
        vmem_cap = int(pltpu.get_tpu_info().vmem_capacity_bytes)
    except Exception:
        vmem_cap = 64 << 20                         # conservative (v7x)
    if vmem_cap >= (128 << 20):                     # v5e / v6e
        block_budget = 16 << 20
        vmem_cap_limit = 96 << 20
    else:                                           # v7x (64 MiB VMEM)
        block_budget = 8 << 20
        vmem_cap_limit = 44 << 20
    if max_block_bytes is not None:
        block_budget = int(max_block_bytes)

    tb, tf = _pick_tiles(B, F, itemsize, block_budget)
    grid = (pl.cdiv(B, tb), pl.cdiv(F, tf))

    block_bytes = tb * tf * itemsize
    # in + out, double-buffered (~4x block) + mask + slack, capped per chip.
    vmem_limit = int(min(max(4 * block_bytes + (2 << 20), 16 << 20),
                         vmem_cap_limit))

    out2d = pl.pallas_call(
        _drop_path_kernel,
        out_shape=jax.ShapeDtypeStruct((B, F), x2d.dtype),
        grid=grid,
        in_specs=[pl.BlockSpec((tb, tf), lambda i, j: (i, j)),
                  pl.BlockSpec((tb, 1), lambda i, j: (i, 0))],
        out_specs=pl.BlockSpec((tb, tf), lambda i, j: (i, j)),
        compiler_params=pltpu.CompilerParams(
            dimension_semantics=("parallel", "parallel"),
            vmem_limit_bytes=vmem_limit),
        cost_estimate=pl.CostEstimate(
            flops=B * F,
            transcendentals=0,
            bytes_accessed=2 * B * F * itemsize),
        input_output_aliases=({0: 0} if donate_x else {}),
    )(x2d, mask)

    return out2d.reshape(x.shape)


if __name__ == "__main__":
    key = jax.random.PRNGKey(0)
    batch, channels, h, w = 2, 4, 16, 16
    x = jax.random.normal(key, (batch, channels, h, w), jnp.float32)

    drop_prob = 0.25
    keep_prob = 1.0 - drop_prob

    # 1) Inference / drop_prob == 0 paths are the identity.
    y_eval = drop_path_pallas(x, drop_prob=drop_prob, training=False)
    assert jnp.array_equal(y_eval, x)
    y_p0 = drop_path_pallas(x, drop_prob=0.0, training=True)
    assert jnp.array_equal(y_p0, x)

    # 2) Training path (default full-row tiles): each sample is either fully
    #    dropped (zeros) or passed through scaled by 1/keep_prob.
    y = drop_path_pallas(x, drop_prob=drop_prob, training=True,
                         scale_by_keep=True, seed=123)
    y = jax.block_until_ready(y)
    assert y.shape == x.shape and y.dtype == x.dtype
    for b in range(batch):
        dropped = bool(jnp.allclose(y[b], 0.0, atol=1e-6))
        kept = bool(jnp.allclose(y[b], x[b] / keep_prob, atol=1e-5, rtol=1e-5))
        assert dropped or kept, f"sample {b}: invalid drop-path output"

    # 3) Force a tiny block budget so the feature axis is split into several
    #    tiles; result must be identical (mask consistent across tiles).
    y_tiled = drop_path_pallas(x, drop_prob=drop_prob, training=True,
                               scale_by_keep=True, seed=123,
                               max_block_bytes=2048)
    y_tiled = jax.block_until_ready(y_tiled)
    assert jnp.allclose(y_tiled, y, atol=1e-6)

    # 4) scale_by_keep=False: kept samples pass through unscaled.
    y_ns = drop_path_pallas(x, drop_prob=drop_prob, training=True,
                            scale_by_keep=False, seed=123)
    y_ns = jax.block_until_ready(y_ns)
    for b in range(batch):
        dropped = bool(jnp.allclose(y_ns[b], 0.0, atol=1e-6))
        kept = bool(jnp.allclose(y_ns[b], x[b], atol=1e-6))
        assert dropped or kept, f"sample {b}: invalid unscaled output"

    print("KERNEL_OK")
</pallas_src>

<mosaic_0001>
module attributes {stable_mosaic.version = 11 : i64} {
  func.func @_drop_path_kernel(%arg0: i32, %arg1: i32, %arg2: memref<2x1024xf32, #tpu.memory_space<vmem>>, %arg3: memref<2x1xf32, #tpu.memory_space<vmem>>, %arg4: memref<2x1024xf32, #tpu.memory_space<vmem>>) attributes {dimension_semantics = [#tpu.dimension_semantics<parallel>, #tpu.dimension_semantics<parallel>], iteration_bounds = array<i64: 1, 1>, scalar_prefetch = 0 : i64, scratch_operands = 0 : i64, tpu.core_type = #tpu.core_type<tc>, window_params = [{transform_indices = @transform_0, window_bounds = array<i64: 2, 1024>}, {transform_indices = @transform_1, window_bounds = array<i64: 2, 1>}, {transform_indices = @transform_2, window_bounds = array<i64: 2, 1024>}]} {
    %c0 = arith.constant 0 : index
    %c0_0 = arith.constant 0 : index
    %0 = vector.load %arg2[%c0, %c0_0] : memref<2x1024xf32, #tpu.memory_space<vmem>>, vector<2x1024xf32>
    %c0_1 = arith.constant 0 : index
    %c0_2 = arith.constant 0 : index
    %1 = vector.load %arg3[%c0_1, %c0_2] : memref<2x1xf32, #tpu.memory_space<vmem>>, vector<2x1xf32>
    %2 = vector.broadcast %1 : vector<2x1xf32> to vector<2x1024xf32>
    %3 = arith.mulf %0, %2 : vector<2x1024xf32>
    %c0_3 = arith.constant 0 : index
    %c0_4 = arith.constant 0 : index
    %4 = vector.load %arg4[%c0_3, %c0_4] : memref<2x1024xf32, #tpu.memory_space<vmem>>, vector<2x1024xf32>
    tpu.vector_store %arg4[%c0_3, %c0_4], %3 {strides = array<i32>} : memref<2x1024xf32, #tpu.memory_space<vmem>>, vector<2x1024xf32>,
    return
  }
  func.func @transform_0(%arg0: i32, %arg1: i32) -> (i32, i32) {
    %c0_i32 = arith.constant 0 : i32
    return %arg0, %arg1 : i32, i32
  }
  func.func @transform_1(%arg0: i32, %arg1: i32) -> (i32, i32) {
    %c0_i32 = arith.constant 0 : i32
    %c0_i32_0 = arith.constant 0 : i32
    return %arg0, %c0_i32 : i32, i32
  }
  func.func @transform_2(%arg0: i32, %arg1: i32) -> (i32, i32) {
    %c0_i32 = arith.constant 0 : i32
    return %arg0, %arg1 : i32, i32
  }
}

</mosaic_0001>

<bundles_post_ra>
// kernel: tpu_custom_call.1
= control target key start
LH: loop header
LB: loop body
LE: loop exit
PB: predicated region body
PF: predicated region fallthrough
CT: control target
= control target key end

     0   :  { %7 = vsyncpa [#allocation3], 0  ;;  %s157_s0 = inlined_call_operand.hbm [shape: f32[2,1024], index: 0, kind: input, shape index: {}]   ;;  %s158_s1 = inlined_call_operand.vmem [shape: f32[2,1], index: 1, kind: input, shape index: {}]   ;;  %s159_s2 = inlined_call_operand.hbm [shape: f32[2,1024], index: 2, kind: output, shape index: {}]  }
   0x1   :  { %8 = vsyncpa [#allocation4], 0  ;;  %s111_s9 = smov [#allocation2]   ;;  %s63_s13 = scalar_lea.hbm %s157_s0, 256 }
   0x2   :  { %s15_s10 = sshll.u32 %s111_s9, 4  ;;  %p64_p0 = scmp.ne.s32.totalorder %s157_s0, %s63_s13  ;;  %s16_s10 = int_to_ptr.vmem [resolvable:$true] %s15_s10 }
   0x3   :  { %p67_p1 = scmp.lt.u32.totalorder %s63_s13, %s157_s0 }
   0x5   :  { %p69_p2 = pnand %p67_p1, %p64_p0 }
   0x7   :  { %72 = shalt.err (!%p69_p2)
}
   0x8   :  { %s73_s18 = scalar_lea.vmem %s16_s10, 256  ;;  %p78_p4 = scmp.lt.s32.totalorder %s16_s10, %s16_s10 }
   0x9   :  { %p74_p3 = scmp.ne.s32.totalorder %s16_s10, %s73_s18  ;;  %p79_p5 = scmp.lt.s32.totalorder %s73_s18, %s73_s18 }
   0xb   :  { %p80_p6 = por %p79_p5, %p78_p4 }
   0xd   :  { %p81_p7 = pnand %p80_p6, %p74_p3 }
   0xf   :  { %84 = shalt.err (!%p81_p7)
}
  0x10   :  { %18 = dma.hbm_to_vmem [thread:$0]  %s157_s0, 256, %s16_s10, [#allocation3]  }
  0x11   :  { %107 = dma.done.wait [#allocation3], 256  }
  0x12   :  { %108 = vsyncadd [#allocation3], 4294967040  ;;  %v112_v0 = vmov 0   ;;  %v26_v1 = vld [vmem:[%s158_s1] sm:$0x3]  ;;  %v34_v4 = vlaneseq  ;;  %v25_v10 = vld [vmem:[#allocation2 + $0x8] sm:$0xff] }
  0x13   :  { %62 = vset.pattern.permute.xlu0 %v112_v0  ;;  %v113_v2 = vmov 269488144   ;;  %v24_v9 = vld [vmem:[#allocation2] sm:$0xff]  ;;  %s114_s23 = smov [#allocation5]  }
  0x14   :  { %29 = vperm.xlu0 %62, %v26_v1   ;;  %v32_v3 = vunpack.c.l.s4 %v113_v2  ;;  %v35_v6 = vshrl.u32 %v34_v4, 7  ;;  %s49_s0 = sshll.u32 %s114_s23, 4  ;;  %s50_s0 = int_to_ptr.vmem [resolvable:$true] %s49_s0 }
  0x15   :  { %s85_s24 = scalar_lea.vmem %s50_s0, 256  ;;  %p90_p9 = scmp.lt.s32.totalorder %s50_s0, %s50_s0 }
  0x16   :  { %v33_v5 = vunpack.c.0.s8 %v32_v3  ;;  %p86_p8 = scmp.ne.s32.totalorder %s50_s0, %s85_s24  ;;  %p91_p10 = scmp.lt.s32.totalorder %s85_s24, %s85_s24 }
  0x18   :  { %v36_v7 = vsub.s32 %v33_v5, %v35_v6  ;;  %p92_p11 = por %p91_p10, %p90_p9 }
  0x1a   :  { %p93_p12 = pnand %p92_p11, %p86_p8 }
  0x93   :  { %v30_v8 = vpop.permute.xlu0 %29 }
  0x94   :  { %v37_v11 = vrot.slane %v30_v8, %v36_v7 }
  0x96   :  { %v39_v12 = vmul.f32 %v37_v11, %v24_v9  ;;  %v40_v13 = vmul.f32 %v37_v11, %v25_v10 }
  0x98   :  { %41 = vst [vmem:[#allocation5] sm:$0xff] %v39_v12  ;;  %42 = vst [vmem:[#allocation5 + $0x8] sm:$0xff] %v40_v13 }
  0x99   :  { %96 = shalt.err (!%p93_p12)
}
  0x9a   :  { %s97_s26 = scalar_lea.hbm %s159_s2, 256 }
  0x9b   :  { %p98_p13 = scmp.ne.s32.totalorder %s159_s2, %s97_s26  ;;  %p101_p0 = scmp.lt.u32.totalorder %s97_s26, %s159_s2 }
  0x9d   :  { %p103_p1 = pnand %p101_p0, %p98_p13 }
  0x9f   :  { %106 = shalt.err (!%p103_p1)
}
  0xa0   :  { %52 = dma.vmem_to_hbm [thread:$0]  %s50_s0, 256, %s159_s2, [#allocation4]  }
  0xa1   :  { %109 = dma.done.wait [#allocation4], 256  }
  0xa2   :  { %110 = vsyncadd [#allocation4], 4294967040 }
  0xa3   :  { %56 = vsyncpa [#allocation3], 1 }
  0xa4   :  { %57 = vsyncpa [#allocation4], 1 }

</bundles_post_ra>
